<compile_context>
chip_gen: v7x
topology: tpu7x:2x2x1
jax: 0.10.0
libtpu: 0.0.40
codegen_flags: <defaults>
</compile_context>

<pallas_src>
import functools

import jax
import jax.numpy as jnp
from jax.experimental import pallas as pl
from jax.experimental.pallas import tpu as pltpu


def _round_up(n, m):
    return ((n + m - 1) // m) * m


# Per-generation scoped-VMEM ceiling and batch-tile cap.
_VMEM_CEILING = {5: 100 << 20, 6: 100 << 20, 7: 48 << 20}
_TILE_CAP = {5: 1024, 6: 1024, 7: 512}


def _tpu_generation():
    try:
        kind = jax.devices()[0].device_kind.lower()
    except Exception:
        return 6
    for g in (7, 6, 5):
        if "v%d" % g in kind:
            return g
    return 6


def dense_ae_kernel(x_ref, w1_ref, b1_ref, w2_ref, b2_ref, w3_ref, b3_ref,
                    out_ref, *, nb_active):
    # x_ref: [TB, D] f32/bf16   w1: [D, Hd] bf16   b1: [1, Hd] f32
    # w2:   [Hd, Hd] bf16       b2: [1, Hd] f32
    # w3:   [Hd, D]  bf16       b3: [1, D]  f32    out: [TB, D]
    x = x_ref[...].astype(jnp.bfloat16)

    # ---- encode: Linear -> ReLU -> Linear (bf16 MXU operands, f32 accum) ----
    h1 = jnp.dot(x, w1_ref[...], preferred_element_type=jnp.float32) + b1_ref[...]
    h1 = jnp.maximum(h1, 0.0)                                   # f32 VPU (v5e-safe)
    h2 = jnp.dot(h1.astype(jnp.bfloat16), w2_ref[...],
                 preferred_element_type=jnp.float32) + b2_ref[...]

    # ---- ksparse: keep entries >= the k-th largest value per row ----
    # k-step selection that removes exactly ONE element per iteration (smallest
    # column index among the current maxima), so after k steps `thresh` is the
    # exact k-th largest value even when duplicates appear among the top-k.
    # All reductions are row XLU ops; O(k*Hd), no [TB, Hd, Hd] intermediate.
    # TODO(synk): ties exactly at the k-th value keep all tied entries (torch's
    # ksparse keeps exactly nb_active with an arbitrary tie-break).
    tb, hd = h2.shape
    k = min(int(nb_active), hd)
    if k > 0:
        col = jax.lax.broadcasted_iota(jnp.int32, (tb, hd), 1)  # hoisted out of loop

        def body(_, carry):
            thresh, masked = carry
            thresh = jnp.max(masked, axis=-1, keepdims=True)
            is_max = masked >= thresh
            first = jnp.min(jnp.where(is_max, col, hd), axis=-1, keepdims=True)
            masked = jnp.where(col == first, -jnp.inf, masked)
            return thresh, masked

        thresh, _ = jax.lax.fori_loop(
            0, k, body,
            (jnp.full((tb, 1), jnp.inf, jnp.float32), h2),
            unroll=True)
        h_sparse = jnp.where(h2 >= thresh, h2, 0.0)
    else:
        h_sparse = jnp.zeros_like(h2)

    # ---- decode: Linear -> Sigmoid ----
    logits = jnp.dot(h_sparse.astype(jnp.bfloat16), w3_ref[...],
                     preferred_element_type=jnp.float32) + b3_ref[...]
    out_ref[...] = jax.nn.sigmoid(logits).astype(out_ref.dtype)


def dense_ae_forward(x_nchw, params, nb_active, *, tile_b_cap=None,
                     out_dtype=jnp.float32):
    B, C, H, W = x_nchw.shape
    D = C * H * W
    w1, b1, w2, b2, w3, b3 = params
    Hd = w1.shape[1]

    # Keep bf16 inputs as bf16 (halves x DMA); everything else goes to f32.
    x2d = x_nchw.reshape(B, D)
    if x2d.dtype not in (jnp.dtype(jnp.bfloat16), jnp.dtype(jnp.float32)):
        x2d = x2d.astype(jnp.float32)
    x_itemsize = x2d.dtype.itemsize
    out_itemsize = jnp.dtype(out_dtype).itemsize

    gen = _tpu_generation()
    ceiling = _VMEM_CEILING.get(gen, 100 << 20)
    cap = tile_b_cap if tile_b_cap is not None else _TILE_CAP.get(gen, 1024)

    # ---- VMEM budgeting: resident weights (single-buffered) + per-row cost ----
    weights_bytes = ((D * Hd + Hd * Hd + Hd * D) * w1.dtype.itemsize
                     + (2 * Hd + D) * 4)                         # biases (f32)
    if weights_bytes > int(0.7 * ceiling):
        # TODO(synk): K/N-tiled encode/decode fallback for weights that exceed
        # the per-TC VMEM budget (needed ~2x sooner on v7x's 64 MiB than v5e/v6e).
        raise NotImplementedError(
            "resident weights (%d bytes) exceed the per-core VMEM budget (%d); "
            "K/N-tiled fallback not implemented" % (weights_bytes, ceiling))

    per_row_bytes = (2 * D * x_itemsize          # double-buffered x tile
                     + 2 * D * out_itemsize      # double-buffered out tile
                     + D * 4 + D * 2             # logits f32 + bf16 cast of x row
                     + 6 * Hd * 4)               # h1/h2/masked/h_sparse/iota/temps
    budget = int(0.8 * ceiling) - weights_bytes
    tb_budget = max(8, (budget // per_row_bytes) // 8 * 8)

    # ---- batch tile: sublane-aligned, VMEM-bounded, padding-averse ----
    b8 = _round_up(max(B, 1), 8)
    tb = max(8, min(cap, tb_budget, b8))
    if b8 % tb != 0:
        # Prefer a divisor of b8 (avoids padding up to tb-1 dead rows) unless
        # it would shrink the tile by more than 4x.
        t = tb
        while t >= 8 and b8 % t != 0:
            t -= 8
        if t * 4 >= tb:
            tb = t
    b_pad = _round_up(b8, tb)

    # v7x has 2 TensorCores: make sure the "parallel" batch axis has >= 2 steps.
    if gen == 7 and b_pad // tb == 1 and b_pad > 8:
        t = (b_pad // 2) // 8 * 8
        while t >= 8 and b_pad % t != 0:
            t -= 8
        if t >= 8:
            tb = t

    if b_pad != B:
        x2d = jnp.pad(x2d, ((0, b_pad - B), (0, 0)))

    grid = (b_pad // tb,)

    vmem_limit = min(ceiling, weights_bytes + tb * per_row_bytes + (16 << 20))

    flops = 2 * b_pad * (D * Hd + Hd * Hd + Hd * D)
    transcendentals = b_pad * D                      # sigmoid (exp) per output elem
    bytes_accessed = (x2d.size * x2d.dtype.itemsize
                      + sum(int(p.size) * p.dtype.itemsize for p in params)
                      + b_pad * D * out_itemsize)

    resident = pl.Buffered(1)                        # constant index_map -> 1 buffer
    kernel = functools.partial(dense_ae_kernel, nb_active=int(nb_active))
    out2d = pl.pallas_call(
        kernel,
        out_shape=jax.ShapeDtypeStruct((b_pad, D), out_dtype),
        grid_spec=pltpu.PrefetchScalarGridSpec(
            num_scalar_prefetch=0,
            grid=grid,
            in_specs=[
                pl.BlockSpec((tb, D), lambda i: (i, 0)),                      # x tile
                pl.BlockSpec((D, Hd), lambda i: (0, 0), pipeline_mode=resident),  # w1
                pl.BlockSpec((1, Hd), lambda i: (0, 0), pipeline_mode=resident),  # b1
                pl.BlockSpec((Hd, Hd), lambda i: (0, 0), pipeline_mode=resident), # w2
                pl.BlockSpec((1, Hd), lambda i: (0, 0), pipeline_mode=resident),  # b2
                pl.BlockSpec((Hd, D), lambda i: (0, 0), pipeline_mode=resident),  # w3
                pl.BlockSpec((1, D), lambda i: (0, 0), pipeline_mode=resident),   # b3
            ],
            out_specs=pl.BlockSpec((tb, D), lambda i: (i, 0)),
        ),
        compiler_params=pltpu.CompilerParams(
            dimension_semantics=("parallel",),       # megacore / v7x 2-TC sharding
            vmem_limit_bytes=int(vmem_limit),
        ),
        cost_estimate=pl.CostEstimate(
            flops=flops,
            transcendentals=transcendentals,
            bytes_accessed=bytes_accessed,
        ),
    )(x2d, w1, b1, w2, b2, w3, b3)

    return out2d[:B].astype(jnp.float32).reshape(B, C, H, W)


def xavier_uniform(key, fan_in, fan_out):
    # nn.init.xavier_uniform: U(-a, a), a = sqrt(6 / (fan_in + fan_out)).
    bound = (6.0 / (fan_in + fan_out)) ** 0.5
    # Stored as [in, out] (transposed w.r.t. torch's [out, in]).
    return jax.random.uniform(key, (fan_in, fan_out), jnp.float32,
                              minval=-bound, maxval=bound)


def make_params(key, d_in, hidden):
    # Note: on v6e/v7x, hidden as a multiple of 256 fills the 2x256x256 MXU;
    # 128-multiples are only native to v5e's 4x128x128 MXU.
    k1, k2, k3 = jax.random.split(key, 3)
    # Weights stored in bf16 (halves HBM->VMEM DMA); biases stay f32.
    w1 = xavier_uniform(k1, d_in, hidden).astype(jnp.bfloat16)
    b1 = jnp.zeros((1, hidden), jnp.float32)
    w2 = xavier_uniform(k2, hidden, hidden).astype(jnp.bfloat16)
    b2 = jnp.zeros((1, hidden), jnp.float32)
    w3 = xavier_uniform(k3, hidden, d_in).astype(jnp.bfloat16)
    b3 = jnp.zeros((1, d_in), jnp.float32)
    return (w1, b1, w2, b2, w3, b3)


def dense_ae_reference(x_nchw, params, nb_active):
    """Pure-JAX reference of the PyTorch forward (same bf16 matmul operands)."""
    B = x_nchw.shape[0]
    x = x_nchw.reshape(B, -1)
    w1, b1, w2, b2, w3, b3 = params
    h = jnp.dot(x.astype(jnp.bfloat16), w1, preferred_element_type=jnp.float32) + b1
    h = jnp.maximum(h, 0.0)
    h = jnp.dot(h.astype(jnp.bfloat16), w2, preferred_element_type=jnp.float32) + b2
    k = min(int(nb_active), h.shape[-1])
    if k > 0:
        kth = jax.lax.top_k(h, k)[0][:, -1:]
    else:
        kth = jnp.full((B, 1), jnp.inf, jnp.float32)
    h = jnp.where(h >= kth, h, 0.0)
    out = jax.nn.sigmoid(
        jnp.dot(h.astype(jnp.bfloat16), w3, preferred_element_type=jnp.float32) + b3)
    return out.reshape(x_nchw.shape)


if __name__ == "__main__":
    # Small shapes consistent with DenseAE(w=16, h=16, c=1, hidden=128, nb_active=10)
    B, C, H, W = 2, 1, 16, 16
    HIDDEN = 128
    NB_ACTIVE = 10
    D = C * H * W

    key = jax.random.PRNGKey(0)
    kx, kp = jax.random.split(key)
    x = jax.random.normal(kx, (B, C, H, W), jnp.float32)
    params = make_params(kp, D, HIDDEN)

    out = dense_ae_forward(x, params, NB_ACTIVE)
    out = jax.block_until_ready(out)

    ref = dense_ae_reference(x, params, NB_ACTIVE)
    assert out.shape == x.shape
    assert jnp.allclose(out, ref, atol=5e-3, rtol=1e-3), (
        float(jnp.max(jnp.abs(out - ref))))

    print("KERNEL_OK")
</pallas_src>

<mosaic_0001>
module attributes {stable_mosaic.version = 11 : i64} {
  func.func @dense_ae_kernel(%arg0: i32, %arg1: memref<8x256xf32, #tpu.memory_space<vmem>>, %arg2: memref<256x128xbf16, #tpu.memory_space<vmem>>, %arg3: memref<1x128xf32, #tpu.memory_space<vmem>>, %arg4: memref<128x128xbf16, #tpu.memory_space<vmem>>, %arg5: memref<1x128xf32, #tpu.memory_space<vmem>>, %arg6: memref<128x256xbf16, #tpu.memory_space<vmem>>, %arg7: memref<1x256xf32, #tpu.memory_space<vmem>>, %arg8: memref<8x256xf32, #tpu.memory_space<vmem>>) attributes {dimension_semantics = [#tpu.dimension_semantics<parallel>], iteration_bounds = array<i64: 1>, scalar_prefetch = 0 : i64, scratch_operands = 0 : i64, tpu.core_type = #tpu.core_type<tc>, window_params = [{transform_indices = @transform_0, window_bounds = array<i64: 8, 256>}, {pipeline_mode = #tpu.pipeline_mode<synchronous>, transform_indices = @transform_1, window_bounds = array<i64: 256, 128>}, {pipeline_mode = #tpu.pipeline_mode<synchronous>, transform_indices = @transform_2, window_bounds = array<i64: 1, 128>}, {pipeline_mode = #tpu.pipeline_mode<synchronous>, transform_indices = @transform_3, window_bounds = array<i64: 128, 128>}, {pipeline_mode = #tpu.pipeline_mode<synchronous>, transform_indices = @transform_4, window_bounds = array<i64: 1, 128>}, {pipeline_mode = #tpu.pipeline_mode<synchronous>, transform_indices = @transform_5, window_bounds = array<i64: 128, 256>}, {pipeline_mode = #tpu.pipeline_mode<synchronous>, transform_indices = @transform_6, window_bounds = array<i64: 1, 256>}, {transform_indices = @transform_7, window_bounds = array<i64: 8, 256>}]} {
    %c0 = arith.constant 0 : index
    %c0_0 = arith.constant 0 : index
    %0 = vector.load %arg1[%c0, %c0_0] : memref<8x256xf32, #tpu.memory_space<vmem>>, vector<8x256xf32>
    %1 = arith.truncf %0 : vector<8x256xf32> to vector<8x256xbf16>
    %c0_1 = arith.constant 0 : index
    %c0_2 = arith.constant 0 : index
    %2 = vector.load %arg2[%c0_1, %c0_2] : memref<256x128xbf16, #tpu.memory_space<vmem>>, vector<256x128xbf16>
    %cst = arith.constant dense<0.000000e+00> : vector<8x128xf32>
    %3 = tpu.matmul %1, %2, %cst {dimension_numbers = #tpu.dot_dimension_numbers<[1], [0], [0], [1], [0, 0, 1, 1], [], []>} : vector<8x256xbf16>, vector<256x128xbf16>, vector<8x128xf32> -> vector<8x128xf32>
    %c0_3 = arith.constant 0 : index
    %c0_4 = arith.constant 0 : index
    %4 = vector.load %arg3[%c0_3, %c0_4] : memref<1x128xf32, #tpu.memory_space<vmem>>, vector<1x128xf32>
    %5 = vector.broadcast %4 : vector<1x128xf32> to vector<8x128xf32>
    %6 = arith.addf %3, %5 : vector<8x128xf32>
    %cst_5 = arith.constant 0.000000e+00 : f32
    %7 = vector.broadcast %cst_5 : f32 to vector<8x128xf32>
    %8 = arith.maximumf %6, %7 : vector<8x128xf32>
    %9 = arith.truncf %8 : vector<8x128xf32> to vector<8x128xbf16>
    %c0_6 = arith.constant 0 : index
    %c0_7 = arith.constant 0 : index
    %10 = vector.load %arg4[%c0_6, %c0_7] : memref<128x128xbf16, #tpu.memory_space<vmem>>, vector<128x128xbf16>
    %cst_8 = arith.constant dense<0.000000e+00> : vector<8x128xf32>
    %11 = tpu.matmul %9, %10, %cst_8 {dimension_numbers = #tpu.dot_dimension_numbers<[1], [0], [0], [1], [0, 0, 1, 1], [], []>} : vector<8x128xbf16>, vector<128x128xbf16>, vector<8x128xf32> -> vector<8x128xf32>
    %c0_9 = arith.constant 0 : index
    %c0_10 = arith.constant 0 : index
    %12 = vector.load %arg5[%c0_9, %c0_10] : memref<1x128xf32, #tpu.memory_space<vmem>>, vector<1x128xf32>
    %13 = vector.broadcast %12 : vector<1x128xf32> to vector<8x128xf32>
    %14 = arith.addf %11, %13 : vector<8x128xf32>
    %15 = tpu.iota {dimensions = array<i32: 1>} : vector<8x128xi32>
    %cst_11 = arith.constant 0x7F800000 : f32
    %16 = vector.broadcast %cst_11 : f32 to vector<8x1xf32>
    %c0_i32 = arith.constant 0 : i32
    %cst_12 = arith.constant dense<0xFF800000> : vector<8xf32>
    %17 = vector.multi_reduction <maximumf>, %14, %cst_12 [1] : vector<8x128xf32> to vector<8xf32>
    %18 = vector.shape_cast %17 : vector<8xf32> to vector<8x1xf32>
    %19 = vector.broadcast %18 : vector<8x1xf32> to vector<8x128xf32>
    %20 = arith.cmpf oge, %14, %19 : vector<8x128xf32>
    %c128_i32 = arith.constant 128 : i32
    %21 = vector.broadcast %c128_i32 : i32 to vector<8x128xi32>
    %22 = arith.select %20, %15, %21 : vector<8x128xi1>, vector<8x128xi32>
    %cst_13 = arith.constant dense<2147483647> : vector<8xi32>
    %23 = vector.multi_reduction <minsi>, %22, %cst_13 [1] : vector<8x128xi32> to vector<8xi32>
    %24 = vector.shape_cast %23 : vector<8xi32> to vector<8x1xi32>
    %25 = vector.broadcast %24 : vector<8x1xi32> to vector<8x128xi32>
    %26 = arith.cmpi eq, %15, %25 : vector<8x128xi32>
    %cst_14 = arith.constant 0xFF800000 : f32
    %27 = vector.broadcast %cst_14 : f32 to vector<8x128xf32>
    %28 = arith.select %26, %27, %14 : vector<8x128xi1>, vector<8x128xf32>
    %c1_i32 = arith.constant 1 : i32
    %cst_15 = arith.constant dense<0xFF800000> : vector<8xf32>
    %29 = vector.multi_reduction <maximumf>, %28, %cst_15 [1] : vector<8x128xf32> to vector<8xf32>
    %30 = vector.shape_cast %29 : vector<8xf32> to vector<8x1xf32>
    %31 = vector.broadcast %30 : vector<8x1xf32> to vector<8x128xf32>
    %32 = arith.cmpf oge, %28, %31 : vector<8x128xf32>
    %c128_i32_16 = arith.constant 128 : i32
    %33 = vector.broadcast %c128_i32_16 : i32 to vector<8x128xi32>
    %34 = arith.select %32, %15, %33 : vector<8x128xi1>, vector<8x128xi32>
    %cst_17 = arith.constant dense<2147483647> : vector<8xi32>
    %35 = vector.multi_reduction <minsi>, %34, %cst_17 [1] : vector<8x128xi32> to vector<8xi32>
    %36 = vector.shape_cast %35 : vector<8xi32> to vector<8x1xi32>
    %37 = vector.broadcast %36 : vector<8x1xi32> to vector<8x128xi32>
    %38 = arith.cmpi eq, %15, %37 : vector<8x128xi32>
    %cst_18 = arith.constant 0xFF800000 : f32
    %39 = vector.broadcast %cst_18 : f32 to vector<8x128xf32>
    %40 = arith.select %38, %39, %28 : vector<8x128xi1>, vector<8x128xf32>
    %c2_i32 = arith.constant 2 : i32
    %cst_19 = arith.constant dense<0xFF800000> : vector<8xf32>
    %41 = vector.multi_reduction <maximumf>, %40, %cst_19 [1] : vector<8x128xf32> to vector<8xf32>
    %42 = vector.shape_cast %41 : vector<8xf32> to vector<8x1xf32>
    %43 = vector.broadcast %42 : vector<8x1xf32> to vector<8x128xf32>
    %44 = arith.cmpf oge, %40, %43 : vector<8x128xf32>
    %c128_i32_20 = arith.constant 128 : i32
    %45 = vector.broadcast %c128_i32_20 : i32 to vector<8x128xi32>
    %46 = arith.select %44, %15, %45 : vector<8x128xi1>, vector<8x128xi32>
    %cst_21 = arith.constant dense<2147483647> : vector<8xi32>
    %47 = vector.multi_reduction <minsi>, %46, %cst_21 [1] : vector<8x128xi32> to vector<8xi32>
    %48 = vector.shape_cast %47 : vector<8xi32> to vector<8x1xi32>
    %49 = vector.broadcast %48 : vector<8x1xi32> to vector<8x128xi32>
    %50 = arith.cmpi eq, %15, %49 : vector<8x128xi32>
    %cst_22 = arith.constant 0xFF800000 : f32
    %51 = vector.broadcast %cst_22 : f32 to vector<8x128xf32>
    %52 = arith.select %50, %51, %40 : vector<8x128xi1>, vector<8x128xf32>
    %c3_i32 = arith.constant 3 : i32
    %cst_23 = arith.constant dense<0xFF800000> : vector<8xf32>
    %53 = vector.multi_reduction <maximumf>, %52, %cst_23 [1] : vector<8x128xf32> to vector<8xf32>
    %54 = vector.shape_cast %53 : vector<8xf32> to vector<8x1xf32>
    %55 = vector.broadcast %54 : vector<8x1xf32> to vector<8x128xf32>
    %56 = arith.cmpf oge, %52, %55 : vector<8x128xf32>
    %c128_i32_24 = arith.constant 128 : i32
    %57 = vector.broadcast %c128_i32_24 : i32 to vector<8x128xi32>
    %58 = arith.select %56, %15, %57 : vector<8x128xi1>, vector<8x128xi32>
    %cst_25 = arith.constant dense<2147483647> : vector<8xi32>
    %59 = vector.multi_reduction <minsi>, %58, %cst_25 [1] : vector<8x128xi32> to vector<8xi32>
    %60 = vector.shape_cast %59 : vector<8xi32> to vector<8x1xi32>
    %61 = vector.broadcast %60 : vector<8x1xi32> to vector<8x128xi32>
    %62 = arith.cmpi eq, %15, %61 : vector<8x128xi32>
    %cst_26 = arith.constant 0xFF800000 : f32
    %63 = vector.broadcast %cst_26 : f32 to vector<8x128xf32>
    %64 = arith.select %62, %63, %52 : vector<8x128xi1>, vector<8x128xf32>
    %c4_i32 = arith.constant 4 : i32
    %cst_27 = arith.constant dense<0xFF800000> : vector<8xf32>
    %65 = vector.multi_reduction <maximumf>, %64, %cst_27 [1] : vector<8x128xf32> to vector<8xf32>
    %66 = vector.shape_cast %65 : vector<8xf32> to vector<8x1xf32>
    %67 = vector.broadcast %66 : vector<8x1xf32> to vector<8x128xf32>
    %68 = arith.cmpf oge, %64, %67 : vector<8x128xf32>
    %c128_i32_28 = arith.constant 128 : i32
    %69 = vector.broadcast %c128_i32_28 : i32 to vector<8x128xi32>
    %70 = arith.select %68, %15, %69 : vector<8x128xi1>, vector<8x128xi32>
    %cst_29 = arith.constant dense<2147483647> : vector<8xi32>
    %71 = vector.multi_reduction <minsi>, %70, %cst_29 [1] : vector<8x128xi32> to vector<8xi32>
    %72 = vector.shape_cast %71 : vector<8xi32> to vector<8x1xi32>
    %73 = vector.broadcast %72 : vector<8x1xi32> to vector<8x128xi32>
    %74 = arith.cmpi eq, %15, %73 : vector<8x128xi32>
    %cst_30 = arith.constant 0xFF800000 : f32
    %75 = vector.broadcast %cst_30 : f32 to vector<8x128xf32>
    %76 = arith.select %74, %75, %64 : vector<8x128xi1>, vector<8x128xf32>
    %c5_i32 = arith.constant 5 : i32
    %cst_31 = arith.constant dense<0xFF800000> : vector<8xf32>
    %77 = vector.multi_reduction <maximumf>, %76, %cst_31 [1] : vector<8x128xf32> to vector<8xf32>
    %78 = vector.shape_cast %77 : vector<8xf32> to vector<8x1xf32>
    %79 = vector.broadcast %78 : vector<8x1xf32> to vector<8x128xf32>
    %80 = arith.cmpf oge, %76, %79 : vector<8x128xf32>
    %c128_i32_32 = arith.constant 128 : i32
    %81 = vector.broadcast %c128_i32_32 : i32 to vector<8x128xi32>
    %82 = arith.select %80, %15, %81 : vector<8x128xi1>, vector<8x128xi32>
    %cst_33 = arith.constant dense<2147483647> : vector<8xi32>
    %83 = vector.multi_reduction <minsi>, %82, %cst_33 [1] : vector<8x128xi32> to vector<8xi32>
    %84 = vector.shape_cast %83 : vector<8xi32> to vector<8x1xi32>
    %85 = vector.broadcast %84 : vector<8x1xi32> to vector<8x128xi32>
    %86 = arith.cmpi eq, %15, %85 : vector<8x128xi32>
    %cst_34 = arith.constant 0xFF800000 : f32
    %87 = vector.broadcast %cst_34 : f32 to vector<8x128xf32>
    %88 = arith.select %86, %87, %76 : vector<8x128xi1>, vector<8x128xf32>
    %c6_i32 = arith.constant 6 : i32
    %cst_35 = arith.constant dense<0xFF800000> : vector<8xf32>
    %89 = vector.multi_reduction <maximumf>, %88, %cst_35 [1] : vector<8x128xf32> to vector<8xf32>
    %90 = vector.shape_cast %89 : vector<8xf32> to vector<8x1xf32>
    %91 = vector.broadcast %90 : vector<8x1xf32> to vector<8x128xf32>
    %92 = arith.cmpf oge, %88, %91 : vector<8x128xf32>
    %c128_i32_36 = arith.constant 128 : i32
    %93 = vector.broadcast %c128_i32_36 : i32 to vector<8x128xi32>
    %94 = arith.select %92, %15, %93 : vector<8x128xi1>, vector<8x128xi32>
    %cst_37 = arith.constant dense<2147483647> : vector<8xi32>
    %95 = vector.multi_reduction <minsi>, %94, %cst_37 [1] : vector<8x128xi32> to vector<8xi32>
    %96 = vector.shape_cast %95 : vector<8xi32> to vector<8x1xi32>
    %97 = vector.broadcast %96 : vector<8x1xi32> to vector<8x128xi32>
    %98 = arith.cmpi eq, %15, %97 : vector<8x128xi32>
    %cst_38 = arith.constant 0xFF800000 : f32
    %99 = vector.broadcast %cst_38 : f32 to vector<8x128xf32>
    %100 = arith.select %98, %99, %88 : vector<8x128xi1>, vector<8x128xf32>
    %c7_i32 = arith.constant 7 : i32
    %cst_39 = arith.constant dense<0xFF800000> : vector<8xf32>
    %101 = vector.multi_reduction <maximumf>, %100, %cst_39 [1] : vector<8x128xf32> to vector<8xf32>
    %102 = vector.shape_cast %101 : vector<8xf32> to vector<8x1xf32>
    %103 = vector.broadcast %102 : vector<8x1xf32> to vector<8x128xf32>
    %104 = arith.cmpf oge, %100, %103 : vector<8x128xf32>
    %c128_i32_40 = arith.constant 128 : i32
    %105 = vector.broadcast %c128_i32_40 : i32 to vector<8x128xi32>
    %106 = arith.select %104, %15, %105 : vector<8x128xi1>, vector<8x128xi32>
    %cst_41 = arith.constant dense<2147483647> : vector<8xi32>
    %107 = vector.multi_reduction <minsi>, %106, %cst_41 [1] : vector<8x128xi32> to vector<8xi32>
    %108 = vector.shape_cast %107 : vector<8xi32> to vector<8x1xi32>
    %109 = vector.broadcast %108 : vector<8x1xi32> to vector<8x128xi32>
    %110 = arith.cmpi eq, %15, %109 : vector<8x128xi32>
    %cst_42 = arith.constant 0xFF800000 : f32
    %111 = vector.broadcast %cst_42 : f32 to vector<8x128xf32>
    %112 = arith.select %110, %111, %100 : vector<8x128xi1>, vector<8x128xf32>
    %c8_i32 = arith.constant 8 : i32
    %cst_43 = arith.constant dense<0xFF800000> : vector<8xf32>
    %113 = vector.multi_reduction <maximumf>, %112, %cst_43 [1] : vector<8x128xf32> to vector<8xf32>
    %114 = vector.shape_cast %113 : vector<8xf32> to vector<8x1xf32>
    %115 = vector.broadcast %114 : vector<8x1xf32> to vector<8x128xf32>
    %116 = arith.cmpf oge, %112, %115 : vector<8x128xf32>
    %c128_i32_44 = arith.constant 128 : i32
    %117 = vector.broadcast %c128_i32_44 : i32 to vector<8x128xi32>
    %118 = arith.select %116, %15, %117 : vector<8x128xi1>, vector<8x128xi32>
    %cst_45 = arith.constant dense<2147483647> : vector<8xi32>
    %119 = vector.multi_reduction <minsi>, %118, %cst_45 [1] : vector<8x128xi32> to vector<8xi32>
    %120 = vector.shape_cast %119 : vector<8xi32> to vector<8x1xi32>
    %121 = vector.broadcast %120 : vector<8x1xi32> to vector<8x128xi32>
    %122 = arith.cmpi eq, %15, %121 : vector<8x128xi32>
    %cst_46 = arith.constant 0xFF800000 : f32
    %123 = vector.broadcast %cst_46 : f32 to vector<8x128xf32>
    %124 = arith.select %122, %123, %112 : vector<8x128xi1>, vector<8x128xf32>
    %c9_i32 = arith.constant 9 : i32
    %cst_47 = arith.constant dense<0xFF800000> : vector<8xf32>
    %125 = vector.multi_reduction <maximumf>, %124, %cst_47 [1] : vector<8x128xf32> to vector<8xf32>
    %126 = vector.shape_cast %125 : vector<8xf32> to vector<8x1xf32>
    %127 = vector.broadcast %126 : vector<8x1xf32> to vector<8x128xf32>
    %128 = arith.cmpf oge, %124, %127 : vector<8x128xf32>
    %c128_i32_48 = arith.constant 128 : i32
    %129 = vector.broadcast %c128_i32_48 : i32 to vector<8x128xi32>
    %130 = arith.select %128, %15, %129 : vector<8x128xi1>, vector<8x128xi32>
    %cst_49 = arith.constant dense<2147483647> : vector<8xi32>
    %131 = vector.multi_reduction <minsi>, %130, %cst_49 [1] : vector<8x128xi32> to vector<8xi32>
    %132 = vector.shape_cast %131 : vector<8xi32> to vector<8x1xi32>
    %133 = vector.broadcast %132 : vector<8x1xi32> to vector<8x128xi32>
    %134 = arith.cmpi eq, %15, %133 : vector<8x128xi32>
    %cst_50 = arith.constant 0xFF800000 : f32
    %135 = vector.broadcast %cst_50 : f32 to vector<8x128xf32>
    %136 = arith.select %134, %135, %124 : vector<8x128xi1>, vector<8x128xf32>
    %137 = vector.broadcast %126 : vector<8x1xf32> to vector<8x128xf32>
    %138 = arith.cmpf oge, %14, %137 : vector<8x128xf32>
    %cst_51 = arith.constant 0.000000e+00 : f32
    %139 = vector.broadcast %cst_51 : f32 to vector<8x128xf32>
    %140 = arith.select %138, %14, %139 : vector<8x128xi1>, vector<8x128xf32>
    %141 = arith.truncf %140 : vector<8x128xf32> to vector<8x128xbf16>
    %c0_52 = arith.constant 0 : index
    %c0_53 = arith.constant 0 : index
    %142 = vector.load %arg6[%c0_52, %c0_53] : memref<128x256xbf16, #tpu.memory_space<vmem>>, vector<128x256xbf16>
    %cst_54 = arith.constant dense<0.000000e+00> : vector<8x256xf32>
    %143 = tpu.matmul %141, %142, %cst_54 {dimension_numbers = #tpu.dot_dimension_numbers<[1], [0], [0], [1], [0, 0, 1, 1], [], []>} : vector<8x128xbf16>, vector<128x256xbf16>, vector<8x256xf32> -> vector<8x256xf32>
    %c0_55 = arith.constant 0 : index
    %c0_56 = arith.constant 0 : index
    %144 = vector.load %arg7[%c0_55, %c0_56] : memref<1x256xf32, #tpu.memory_space<vmem>>, vector<1x256xf32>
    %145 = vector.broadcast %144 : vector<1x256xf32> to vector<8x256xf32>
    %146 = arith.addf %143, %145 : vector<8x256xf32>
    %147 = arith.negf %146 : vector<8x256xf32>
    %148 = math.exp %147 : vector<8x256xf32>
    %cst_57 = arith.constant 1.000000e+00 : f32
    %149 = vector.broadcast %cst_57 : f32 to vector<8x256xf32>
    %150 = arith.addf %149, %148 : vector<8x256xf32>
    %151 = arith.divf %149, %150 : vector<8x256xf32>
    %c0_58 = arith.constant 0 : index
    %c0_59 = arith.constant 0 : index
    %152 = vector.load %arg8[%c0_58, %c0_59] : memref<8x256xf32, #tpu.memory_space<vmem>>, vector<8x256xf32>
    tpu.vector_store %arg8[%c0_58, %c0_59], %151 {strides = array<i32>} : memref<8x256xf32, #tpu.memory_space<vmem>>, vector<8x256xf32>,
    return
  }
  func.func @transform_0(%arg0: i32) -> (i32, i32) {
    %c0_i32 = arith.constant 0 : i32
    %c0_i32_0 = arith.constant 0 : i32
    return %arg0, %c0_i32 : i32, i32
  }
  func.func @transform_1(%arg0: i32) -> (i32, i32) {
    %c0_i32 = arith.constant 0 : i32
    %c0_i32_0 = arith.constant 0 : i32
    %c0_i32_1 = arith.constant 0 : i32
    return %c0_i32, %c0_i32_0 : i32, i32
  }
  func.func @transform_2(%arg0: i32) -> (i32, i32) {
    %c0_i32 = arith.constant 0 : i32
    %c0_i32_0 = arith.constant 0 : i32
    %c0_i32_1 = arith.constant 0 : i32
    return %c0_i32, %c0_i32_0 : i32, i32
  }
  func.func @transform_3(%arg0: i32) -> (i32, i32) {
    %c0_i32 = arith.constant 0 : i32
    %c0_i32_0 = arith.constant 0 : i32
    %c0_i32_1 = arith.constant 0 : i32
    return %c0_i32, %c0_i32_0 : i32, i32
  }
  func.func @transform_4(%arg0: i32) -> (i32, i32) {
    %c0_i32 = arith.constant 0 : i32
    %c0_i32_0 = arith.constant 0 : i32
    %c0_i32_1 = arith.constant 0 : i32
    return %c0_i32, %c0_i32_0 : i32, i32
  }
  func.func @transform_5(%arg0: i32) -> (i32, i32) {
    %c0_i32 = arith.constant 0 : i32
    %c0_i32_0 = arith.constant 0 : i32
    %c0_i32_1 = arith.constant 0 : i32
    return %c0_i32, %c0_i32_0 : i32, i32
  }
  func.func @transform_6(%arg0: i32) -> (i32, i32) {
    %c0_i32 = arith.constant 0 : i32
    %c0_i32_0 = arith.constant 0 : i32
    %c0_i32_1 = arith.constant 0 : i32
    return %c0_i32, %c0_i32_0 : i32, i32
  }
  func.func @transform_7(%arg0: i32) -> (i32, i32) {
    %c0_i32 = arith.constant 0 : i32
    %c0_i32_0 = arith.constant 0 : i32
    return %arg0, %c0_i32 : i32, i32
  }
}

</mosaic_0001>

<bundles_post_ra>
// kernel: tpu_custom_call.1
= control target key start
LH: loop header
LB: loop body
LE: loop exit
PB: predicated region body
PF: predicated region fallthrough
CT: control target
= control target key end

     0   :  { %12 = vsyncpa [#allocation3], 0  ;;  %s1190_s0 = inlined_call_operand.hbm [shape: f32[8,256], index: 0, kind: input, shape index: {}]   ;;  %s1191_s1 = inlined_call_operand.hbm [shape: bf16[256,128], index: 1, kind: input, shape index: {}]   ;;  %s1192_s2 = inlined_call_operand.vmem [shape: f32[1,128], index: 2, kind: input, shape index: {}]   ;;  %s1193_s3 = inlined_call_operand.hbm [shape: bf16[128,128], index: 3, kind: input, shape index: {}]   ;;  %s1194_s4 = inlined_call_operand.vmem [shape: f32[1,128], index: 4, kind: input, shape index: {}]   ;;  %s1195_s5 = inlined_call_operand.hbm [shape: bf16[128,256], index: 5, kind: input, shape index: {}]   ;;  %s1196_s6 = inlined_call_operand.vmem [shape: f32[1,256], index: 6, kind: input, shape index: {}]   ;;  %s1197_s7 = inlined_call_operand.hbm [shape: f32[8,256], index: 7, kind: output, shape index: {}]  }
   0x1   :  { %13 = vsyncpa [#allocation6], 0 }
   0x2   :  { %14 = vsyncpa [#allocation9], 0 }
   0x3   :  { %15 = vsyncpa [#allocation4], 0  ;;  %s1024_s24 = smov [#allocation5]   ;;  %s906_s28 = scalar_lea.hbm %s1191_s1, 2048 }
   0x4   :  { %s31_s25 = sshll.u32 %s1024_s24, 4  ;;  %p907_p0 = scmp.ne.s32.totalorder %s1191_s1, %s906_s28  ;;  %s32_s25 = int_to_ptr.vmem [resolvable:$true] %s31_s25 }
   0x5   :  { %p910_p1 = scmp.lt.u32.totalorder %s906_s28, %s1191_s1 }
   0x7   :  { %p912_p2 = pnand %p910_p1, %p907_p0 }
   0x9   :  { %915 = shalt.err (!%p912_p2)
}
   0xa   :  { %s916_s10 = scalar_lea.vmem %s32_s25, 2048  ;;  %p921_p4 = scmp.lt.s32.totalorder %s32_s25, %s32_s25 }
   0xb   :  { %p917_p3 = scmp.ne.s32.totalorder %s32_s25, %s916_s10  ;;  %p922_p5 = scmp.lt.s32.totalorder %s916_s10, %s916_s10 }
   0xd   :  { %p923_p6 = por %p922_p5, %p921_p4 }
   0xf   :  { %p924_p7 = pnand %p923_p6, %p917_p3 }
  0x11   :  { %927 = shalt.err (!%p924_p7)
}
  0x12   :  { %s1025_s11 = smov 64   ;;  %s1026_s12 = smov 4  }
  0x13   :  { %37 = dma.hbm_to_vmem [thread:$0]  %s1191_s1, 2048, %s32_s25, [#allocation6], %s1025_s11, %s1025_s11, %s1026_s12  }
  0x14   :  { %s1027_s15 = smov [#allocation2]   ;;  %s1028_s17 = smov [#allocation7]  }
  0x15   :  { %s22_s16 = sshll.u32 %s1027_s15, 4  ;;  %s45_s18 = sshll.u32 %s1028_s17, 4  ;;  %s23_s16 = int_to_ptr.vmem [resolvable:$true] %s22_s16  ;;  %s46_s18 = int_to_ptr.vmem [resolvable:$true] %s45_s18 }
  0x16   :  { %s928_s21 = scalar_lea.hbm %s1190_s0, 256 }
  0x17   :  { %p929_p8 = scmp.ne.s32.totalorder %s1190_s0, %s928_s21  ;;  %p932_p9 = scmp.lt.u32.totalorder %s928_s21, %s1190_s0 }
  0x19   :  { %p934_p10 = pnand %p932_p9, %p929_p8 }
  0x1b   :  { %937 = shalt.err (!%p934_p10)
}
  0x1c   :  { %s938_s1 = scalar_lea.vmem %s23_s16, 256  ;;  %p943_p12 = scmp.lt.s32.totalorder %s23_s16, %s23_s16 }
  0x1d   :  { %p939_p11 = scmp.ne.s32.totalorder %s23_s16, %s938_s1  ;;  %p944_p13 = scmp.lt.s32.totalorder %s938_s1, %s938_s1 }
  0x1f   :  { %p945_p0 = por %p944_p13, %p943_p12 }
  0x21   :  { %p946_p1 = pnand %p945_p0, %p939_p11 }
  0x23   :  { %949 = shalt.err (!%p946_p1)
}
  0x24   :  { %25 = dma.hbm_to_vmem [thread:$0]  %s1190_s0, 256, %s23_s16, [#allocation3]  }
  0x25   :  { %s950_s30 = scalar_lea.hbm %s1193_s3, 1024 }
  0x26   :  { %p951_p2 = scmp.ne.s32.totalorder %s1193_s3, %s950_s30  ;;  %p954_p3 = scmp.lt.u32.totalorder %s950_s30, %s1193_s3 }
  0x28   :  { %p956_p4 = pnand %p954_p3, %p951_p2 }
  0x2a   :  { %959 = shalt.err (!%p956_p4)
}
  0x2b   :  { %s960_s14 = scalar_lea.vmem %s46_s18, 1024  ;;  %p965_p6 = scmp.lt.s32.totalorder %s46_s18, %s46_s18 }
  0x2c   :  { %p961_p5 = scmp.ne.s32.totalorder %s46_s18, %s960_s14  ;;  %p966_p7 = scmp.lt.s32.totalorder %s960_s14, %s960_s14 }
  0x2e   :  { %p967_p8 = por %p966_p7, %p965_p6 }
  0x30   :  { %p968_p9 = pnand %p967_p8, %p961_p5 }
  0x32   :  { %971 = shalt.err (!%p968_p9)
}
  0x33   :  { %51 = dma.hbm_to_vmem [thread:$0]  %s1193_s3, 1024, %s46_s18, [#allocation6], %s1025_s11, %s1025_s11, %s1026_s12  }
  0x34   :  { %s1029_s16 = smov [#allocation8]   ;;  %s972_s21 = scalar_lea.hbm %s1195_s5, 2048 }
  0x35   :  { %s59_s17 = sshll.u32 %s1029_s16, 4  ;;  %p973_p10 = scmp.ne.s32.totalorder %s1195_s5, %s972_s21  ;;  %s60_s17 = int_to_ptr.vmem [resolvable:$true] %s59_s17 }
  0x36   :  { %p976_p11 = scmp.lt.u32.totalorder %s972_s21, %s1195_s5 }
  0x38   :  { %p978_p12 = pnand %p976_p11, %p973_p10 }
  0x3a   :  { %981 = shalt.err (!%p978_p12)
}
  0x3b   :  { %s982_s1 = scalar_lea.vmem %s60_s17, 2048  ;;  %p987_p0 = scmp.lt.s32.totalorder %s60_s17, %s60_s17 }
  0x3c   :  { %p983_p13 = scmp.ne.s32.totalorder %s60_s17, %s982_s1  ;;  %p988_p1 = scmp.lt.s32.totalorder %s982_s1, %s982_s1 }
  0x3e   :  { %p989_p2 = por %p988_p1, %p987_p0 }
  0x40   :  { %p990_p3 = pnand %p989_p2, %p983_p13 }
  0x42   :  { %993 = shalt.err (!%p990_p3)
}
  0x43   :  { %s1030_s3 = smov 128   ;;  %s1031_s11 = smov 8  }
  0x44   :  { %65 = dma.hbm_to_vmem [thread:$0]  %s1195_s5, 2048, %s60_s17, [#allocation9], %s1030_s3, %s1030_s3, %s1031_s11  }
  0x45   :  { %1016 = dma.done.wait [#allocation3], 256  }
  0x46   :  { %1017 = vsyncadd [#allocation3], 4294967040 }
  0x47   :  { %1018 = dma.done.wait [#allocation6], 3072  }
  0x48   :  { %1019 = vsyncadd [#allocation6], 4294964224 }
  0x49   :  { %1020 = dma.done.wait [#allocation9], 2048  }
  0x4a   :  { %1021 = vsyncadd [#allocation9], 4294965248  ;;  %v1032_v0 = vmov 0.0   ;;  %v850_v1 = vld [vmem:[#allocation5 + $0x40] sm:$0xff]   ;;  %v852_v3 = vld [vmem:[#allocation5 + $0x48] sm:$0xff]   ;;  %vm1033_vm0 = vmmov 0   ;;  %v373_v44 = vlaneseq }
  0x4b   :  { %818 = vmatprep.subr.bf16.mxu1 %v1032_v0  ;;  %v851_v2 = vld [vmem:[#allocation5] sm:$0xff]   ;;  %787 = vmatprep.subr.bf16.mxu0 %v850_v1  ;;  %v853_v4 = vld [vmem:[#allocation5 + $0x8] sm:$0xff]   ;;  %v854_v5 = vld [vmem:[#allocation5 + $0x50] sm:$0xff]  }
  0x4c   :  { %788 = vmatpush3.bf16.msra.mxu0 %v851_v2  ;;  %v855_v6 = vld [vmem:[#allocation5 + $0x10] sm:$0xff]   ;;  %v856_v7 = vld [vmem:[#allocation5 + $0x58] sm:$0xff]   ;;  %v858_v9 = vld [vmem:[#allocation5 + $0x60] sm:$0xff]   ;;  %834 = vmatprep.mubr.msk.bf16.mxu1 %vm1033_vm0, %v1032_v0  ;;  %v1149_v45 = vand.u32 127, %v373_v44 }
  0x4d   :  { %789 = vmatprep.subr.bf16.mxu0 %v852_v3  ;;  %v857_v8 = vld [vmem:[#allocation5 + $0x18] sm:$0xff]   ;;  %v859_v10 = vld [vmem:[#allocation5 + $0x20] sm:$0xff]   ;;  %v860_v11 = vld [vmem:[#allocation5 + $0x68] sm:$0xff]  }
  0x4e   :  { %v82_v12 = vld [vmem:[#allocation2 + $0x8] sm:$0xff]  ;;  %v866_v14 = vld [vmem:[#allocation7] sm:$0xff]   ;;  %v861_v15 = vld [vmem:[#allocation5 + $0x28] sm:$0xff]  }
  0x4f   :  { %v84_v13 = vpack.c.bf16 %v82_v12, %v82_v12  ;;  %v862_v16 = vld [vmem:[#allocation5 + $0x70] sm:$0xff]   ;;  %819 = vmatpush3.bf16.msra.mxu1 %v866_v14  ;;  %v867_v17 = vld [vmem:[#allocation7 + $0x8] sm:$0xff]   ;;  %v864_v19 = vld [vmem:[#allocation5 + $0x78] sm:$0xff]  }
  0x50   :  { %790 = vmatpush3.bf16.msra.mxu0 %v853_v4  ;;  %v863_v18 = vld [vmem:[#allocation5 + $0x30] sm:$0xff]   ;;  %820 = vmatprep.subr.bf16.mxu1 %v1032_v0  ;;  %v865_v21 = vld [vmem:[#allocation5 + $0x38] sm:$0xff]   ;;  %v870_v25 = vld [vmem:[#allocation7 + $0x20] sm:$0xff]  }
  0x51   :  { %791 = vmatprep.subr.bf16.mxu0 %v854_v5  ;;  %252 = vmatprep.mubr.bf16.mxu0 %v84_v13  ;;  %v868_v20 = vld [vmem:[#allocation7 + $0x10] sm:$0xff]   ;;  %v869_v23 = vld [vmem:[#allocation7 + $0x18] sm:$0xff]   ;;  %v871_v26 = vld [vmem:[#allocation7 + $0x28] sm:$0xff]  }
  0x52   :  { %v81_v22 = vld [vmem:[#allocation2] sm:$0xff]  ;;  %v873_v28 = vld [vmem:[#allocation7 + $0x38] sm:$0xff]  }
  0x53   :  { %821 = vmatpush3.bf16.msra.mxu1 %v867_v17  ;;  %v83_v24 = vpack.c.bf16 %v81_v22, %v81_v22  ;;  %v872_v27 = vld [vmem:[#allocation7 + $0x30] sm:$0xff]  }
  0x54   :  { %792 = vmatpush3.bf16.msra.mxu0 %v855_v6  ;;  %822 = vmatprep.subr.bf16.mxu1 %v1032_v0  ;;  %v740_v30 = vld [vmem:[%s1192_s2] ss:$0 sm:$0xff] }
  0x55   :  { %793 = vmatprep.subr.bf16.mxu0 %v856_v7  ;;  %v757_v38 = vld [vmem:[%s1194_s4] ss:$0 sm:$0xff] }
  0x57   :  { %823 = vmatpush3.bf16.msra.mxu1 %v868_v20 }
  0x58   :  { %794 = vmatpush3.bf16.msra.mxu0 %v857_v8  ;;  %824 = vmatprep.subr.bf16.mxu1 %v1032_v0 }
  0x59   :  { %795 = vmatprep.subr.bf16.mxu0 %v858_v9 }
  0x5b   :  { %825 = vmatpush3.bf16.msra.mxu1 %v869_v23 }
  0x5c   :  { %796 = vmatpush3.bf16.msra.mxu0 %v859_v10  ;;  %826 = vmatprep.subr.bf16.mxu1 %v1032_v0 }
  0x5d   :  { %797 = vmatprep.subr.bf16.mxu0 %v860_v11 }
  0x5f   :  { %827 = vmatpush3.bf16.msra.mxu1 %v870_v25 }
  0x60   :  { %798 = vmatpush3.bf16.msra.mxu0 %v861_v15  ;;  %828 = vmatprep.subr.bf16.mxu1 %v1032_v0 }
  0x61   :  { %799 = vmatprep.subr.bf16.mxu0 %v862_v16 }
  0x63   :  { %829 = vmatpush3.bf16.msra.mxu1 %v871_v26 }
  0x64   :  { %800 = vmatpush3.bf16.msra.mxu0 %v863_v18  ;;  %830 = vmatprep.subr.bf16.mxu1 %v1032_v0 }
  0x65   :  { %801 = vmatprep.subr.bf16.mxu0 %v864_v19 }
  0x67   :  { %831 = vmatpush3.bf16.msra.mxu1 %v872_v27 }
  0x68   :  { %802 = vmatpush3.bf16.msra.mxu0 %v865_v21  ;;  %832 = vmatprep.subr.bf16.mxu1 %v1032_v0 }
  0x6b   :  { %253 = vmatmul.mubr.bf16.vlgmr.msra.gmra.mrb[0].mxu0 %v83_v24  ;;  %833 = vmatpush3.bf16.msra.mxu1 %v873_v28 }
 0x13e   :  { %v803_v29 = vpop.f32.mrb[0].mxu0 }
 0x13f   :  { %v804_v31 = vpop.f32.mrb[1].mxu0 }
 0x140   :  { %v805_v32 = vadd.f32 %v804_v31, %v803_v29  ;;  %v806_v33 = vpop.f32.mrb[2].mxu0 }
 0x141   :  { %v807_v34 = vpop.f32.mrb[3].mxu0 }
 0x142   :  { %v255_v35 = vadd.f32 %v805_v32, %v740_v30 }
 0x144   :  { %v260_v36 = vmax.f32 %v255_v35, 0.0 }
 0x146   :  { %v261_v37 = vpack.c.bf16 %v260_v36, %v260_v36 }
 0x148   :  { %835 = vmatmul.mubr.bf16.vlgmr.msra.gmra.mrb[0].mxu1 %v261_v37 }
 0x21b   :  { %v367_v39 = vpop.f32.mrb[0].mxu1 }
 0x21c   :  { %v1145_v40 = vadd.f32 %v757_v38, %v367_v39  ;;  %v836_v41 = vpop.f32.mrb[1].mxu1 }
 0x21d   :  { %v370_v42 = vpop.f32.mrb[2].mxu1 }
 0x21e   :  { %375 = vmax.xlane.f32.xlu0 %v1145_v40  ;;  %v837_v43 = vpop.f32.mrb[3].mxu1 }
 0x2ab   :  { %v376_v46 = vpop.xlane.xlu0 %375 }
 0x2ac   :  { %vm377_vm1 = vcmp.ge.f32.partialorder %v1145_v40, %v376_v46 }
 0x2ad   :  { %v378_v47 = vsel %vm377_vm1, %v1149_v45, 128 }
 0x2ae   :  { %v380_v48 = vshra.s32 %v378_v47, 16  ;;  %v379_v50 = vand.u32 65535, %v378_v47 }
 0x2b0   :  { %v382_v49 = vcvt.s32.f32 %v380_v48  ;;  %v381_v52 = vcvt.s32.f32 %v379_v50 }
 0x2b2   :  { %383 = vmin.xlane.f32.xlu0 %v382_v49 }
 0x33f   :  { %v384_v51 = vpop.xlane.xlu0 %383 }
 0x340   :  { %vm385_vm2 = vcmp.eq.f32.partialorder %v382_v49, %v384_v51  ;;  %v390_v54 = vcvt.f32.s32 %v384_v51 }
 0x341   :  { %v386_v53 = vsel %vm385_vm2, %v381_v52, inf }
 0x342   :  { %387 = vmin.xlane.f32.xlu1 %v386_v53  ;;  %v391_v56 = vshll.u32 %v390_v54, 16 }
 0x3cf   :  { %v388_v55 = vpop.xlane.xlu1 %387 }
 0x3d0   :  { %v389_v57 = vcvt.f32.s32 %v388_v55 }
 0x3d2   :  { %v392_v58 = vadd.s32 %v391_v56, %v389_v57 }
 0x3d4   :  { %vm393_vm3 = vcmp.eq.s32.totalorder %v1149_v45, %v392_v58 }
 0x3d5   :  { %v394_v59 = vsel %vm393_vm3, -inf, %v1145_v40 }
 0x3d6   :  { %395 = vmax.xlane.f32.xlu1 %v394_v59 }
 0x463   :  { %v396_v60 = vpop.xlane.xlu1 %395 }
 0x464   :  { %vm397_vm4 = vcmp.ge.f32.partialorder %v394_v59, %v396_v60 }
 0x465   :  { %v398_v61 = vsel %vm397_vm4, %v1149_v45, 128 }
 0x466   :  { %v400_v62 = vshra.s32 %v398_v61, 16  ;;  %v399_v0 = vand.u32 65535, %v398_v61 }
 0x468   :  { %v402_v63 = vcvt.s32.f32 %v400_v62  ;;  %v401_v2 = vcvt.s32.f32 %v399_v0 }
 0x46a   :  { %403 = vmin.xlane.f32.xlu0 %v402_v63 }
 0x4f7   :  { %v404_v1 = vpop.xlane.xlu0 %403 }
 0x4f8   :  { %vm405_vm5 = vcmp.eq.f32.partialorder %v402_v63, %v404_v1  ;;  %v410_v4 = vcvt.f32.s32 %v404_v1 }
 0x4f9   :  { %v406_v3 = vsel %vm405_vm5, %v401_v2, inf }
 0x4fa   :  { %407 = vmin.xlane.f32.xlu1 %v406_v3  ;;  %v411_v6 = vshll.u32 %v410_v4, 16 }
 0x587   :  { %v408_v5 = vpop.xlane.xlu1 %407 }
 0x588   :  { %v409_v7 = vcvt.f32.s32 %v408_v5 }
 0x58a   :  { %v412_v8 = vadd.s32 %v411_v6, %v409_v7 }
 0x58c   :  { %vm413_vm6 = vcmp.eq.s32.totalorder %v1149_v45, %v412_v8 }
 0x58d   :  { %v414_v9 = vsel %vm413_vm6, -inf, %v394_v59 }
 0x58e   :  { %415 = vmax.xlane.f32.xlu0 %v414_v9 }
 0x61b   :  { %v416_v10 = vpop.xlane.xlu0 %415 }
 0x61c   :  { %vm417_vm7 = vcmp.ge.f32.partialorder %v414_v9, %v416_v10 }
 0x61d   :  { %v418_v11 = vsel %vm417_vm7, %v1149_v45, 128 }
 0x61e   :  { %v420_v12 = vshra.s32 %v418_v11, 16  ;;  %v419_v14 = vand.u32 65535, %v418_v11 }
 0x620   :  { %v422_v13 = vcvt.s32.f32 %v420_v12  ;;  %v421_v16 = vcvt.s32.f32 %v419_v14 }
 0x622   :  { %423 = vmin.xlane.f32.xlu1 %v422_v13 }
 0x6af   :  { %v424_v15 = vpop.xlane.xlu1 %423 }
 0x6b0   :  { %vm425_vm8 = vcmp.eq.f32.partialorder %v422_v13, %v424_v15  ;;  %v430_v18 = vcvt.f32.s32 %v424_v15 }
 0x6b1   :  { %v426_v17 = vsel %vm425_vm8, %v421_v16, inf }
 0x6b2   :  { %427 = vmin.xlane.f32.xlu0 %v426_v17  ;;  %v431_v20 = vshll.u32 %v430_v18, 16 }
 0x73f   :  { %v428_v19 = vpop.xlane.xlu0 %427 }
 0x740   :  { %v429_v21 = vcvt.f32.s32 %v428_v19 }
 0x742   :  { %v432_v22 = vadd.s32 %v431_v20, %v429_v21 }
 0x744   :  { %vm433_vm9 = vcmp.eq.s32.totalorder %v1149_v45, %v432_v22 }
 0x745   :  { %v434_v23 = vsel %vm433_vm9, -inf, %v414_v9 }
 0x746   :  { %435 = vmax.xlane.f32.xlu1 %v434_v23 }
 0x7d3   :  { %v436_v24 = vpop.xlane.xlu1 %435 }
 0x7d4   :  { %vm437_vm10 = vcmp.ge.f32.partialorder %v434_v23, %v436_v24 }
 0x7d5   :  { %v438_v25 = vsel %vm437_vm10, %v1149_v45, 128 }
 0x7d6   :  { %v440_v26 = vshra.s32 %v438_v25, 16  ;;  %v439_v28 = vand.u32 65535, %v438_v25 }
 0x7d8   :  { %v442_v27 = vcvt.s32.f32 %v440_v26  ;;  %v441_v30 = vcvt.s32.f32 %v439_v28 }
 0x7da   :  { %443 = vmin.xlane.f32.xlu0 %v442_v27 }
 0x867   :  { %v444_v29 = vpop.xlane.xlu0 %443 }
 0x868   :  { %vm445_vm11 = vcmp.eq.f32.partialorder %v442_v27, %v444_v29  ;;  %v450_v32 = vcvt.f32.s32 %v444_v29 }
 0x869   :  { %v446_v31 = vsel %vm445_vm11, %v441_v30, inf }
 0x86a   :  { %447 = vmin.xlane.f32.xlu1 %v446_v31  ;;  %v451_v34 = vshll.u32 %v450_v32, 16 }
 0x8f7   :  { %v448_v33 = vpop.xlane.xlu1 %447 }
 0x8f8   :  { %v449_v35 = vcvt.f32.s32 %v448_v33 }
 0x8fa   :  { %v452_v36 = vadd.s32 %v451_v34, %v449_v35 }
 0x8fc   :  { %vm453_vm12 = vcmp.eq.s32.totalorder %v1149_v45, %v452_v36 }
 0x8fd   :  { %v454_v37 = vsel %vm453_vm12, -inf, %v434_v23 }
 0x8fe   :  { %455 = vmax.xlane.f32.xlu0 %v454_v37 }
 0x98b   :  { %v456_v38 = vpop.xlane.xlu0 %455 }
 0x98c   :  { %vm457_vm13 = vcmp.ge.f32.partialorder %v454_v37, %v456_v38 }
 0x98d   :  { %v458_v39 = vsel %vm457_vm13, %v1149_v45, 128 }
 0x98e   :  { %v460_v41 = vshra.s32 %v458_v39, 16  ;;  %v459_v43 = vand.u32 65535, %v458_v39 }
 0x990   :  { %v462_v42 = vcvt.s32.f32 %v460_v41  ;;  %v461_v47 = vcvt.s32.f32 %v459_v43  ;;  %v876_v43 = vld [vmem:[#allocation8 + $0x4] ss:$8 sps:$4 sm:$0xff]  }
 0x991   :  { %668 = vmatprep.subr.bf16.mxu0 %v876_v43 }
 0x992   :  { %463 = vmin.xlane.f32.xlu1 %v462_v42 }
 0xa1f   :  { %v464_v46 = vpop.xlane.xlu1 %463 }
 0xa20   :  { %vm465_vm14 = vcmp.eq.f32.partialorder %v462_v42, %v464_v46  ;;  %v470_v49 = vcvt.f32.s32 %v464_v46  ;;  %v874_v42 = vld [vmem:[#allocation8] ss:$8 sps:$4 sm:$0xff]   ;;  %v879_v46 = vld [vmem:[#allocation8 + $0x14] ss:$8 sps:$4 sm:$0xff]  }
 0xa21   :  { %v466_v48 = vsel %vm465_vm14, %v461_v47, inf  ;;  %669 = vmatpush1.bf16.msra.mxu0 %v874_v42  ;;  %v877_v47 = vld [vmem:[#allocation8 + $0x10] ss:$8 sps:$4 sm:$0xff]  }
 0xa22   :  { %467 = vmin.xlane.f32.xlu0 %v466_v48  ;;  %v471_v51 = vshll.u32 %v470_v49, 16  ;;  %670 = vmatprep.subr.bf16.mxu0 %v879_v46  ;;  %v882_v48 = vld [vmem:[#allocation8 + $0x24] ss:$8 sps:$4 sm:$0xff]   ;;  %v880_v49 = vld [vmem:[#allocation8 + $0x20] ss:$8 sps:$4 sm:$0xff]  }
 0xa25   :  { %671 = vmatpush1.bf16.msra.mxu0 %v877_v47 }
 0xa26   :  { %672 = vmatprep.subr.bf16.mxu0 %v882_v48 }
 0xa29   :  { %673 = vmatpush1.bf16.msra.mxu0 %v880_v49 }
 0xaaf   :  { %v468_v50 = vpop.xlane.xlu0 %467 }
 0xab0   :  { %v469_v52 = vcvt.f32.s32 %v468_v50  ;;  %v885_v50 = vld [vmem:[#allocation8 + $0x34] ss:$8 sps:$4 sm:$0xff]  }
 0xab1   :  { %674 = vmatprep.subr.bf16.mxu0 %v885_v50 }
 0xab2   :  { %v472_v53 = vadd.s32 %v471_v51, %v469_v52  ;;  %v883_v51 = vld [vmem:[#allocation8 + $0x30] ss:$8 sps:$4 sm:$0xff]   ;;  %v888_v52 = vld [vmem:[#allocation8 + $0x44] ss:$8 sps:$4 sm:$0xff]  }
 0xab3   :  { %675 = vmatpush1.bf16.msra.mxu0 %v883_v51 }
 0xab4   :  { %vm473_vm15 = vcmp.eq.s32.totalorder %v1149_v45, %v472_v53  ;;  %v886_v53 = vld [vmem:[#allocation8 + $0x40] ss:$8 sps:$4 sm:$0xff]   ;;  %676 = vmatprep.subr.bf16.mxu0 %v888_v52 }
 0xab5   :  { %v474_v54 = vsel %vm473_vm15, -inf, %v454_v37 }
 0xab6   :  { %475 = vmax.xlane.f32.xlu1 %v474_v54 }
 0xab7   :  { %677 = vmatpush1.bf16.msra.mxu0 %v886_v53 }
 0xb43   :  { %v476_v55 = vpop.xlane.xlu1 %475 }
 0xb44   :  { %vm477_vm0 = vcmp.ge.f32.partialorder %v474_v54, %v476_v55  ;;  %v889_v55 = vld [vmem:[#allocation8 + $0x50] ss:$8 sps:$4 sm:$0xff]  }
 0xb45   :  { %v478_v56 = vsel %vm477_vm0, %v1149_v45, 128 }
 0xb46   :  { %v480_v57 = vshra.s32 %v478_v56, 16  ;;  %v479_v59 = vand.u32 65535, %v478_v56  ;;  %v894_v56 = vld [vmem:[#allocation8 + $0x64] ss:$8 sps:$4 sm:$0xff]  }
 0xb48   :  { %v482_v58 = vcvt.s32.f32 %v480_v57  ;;  %v481_v61 = vcvt.s32.f32 %v479_v59  ;;  %v892_v57 = vld [vmem:[#allocation8 + $0x60] ss:$8 sps:$4 sm:$0xff]   ;;  %v895_v59 = vld [vmem:[#allocation8 + $0x70] ss:$8 sps:$4 sm:$0xff]  }
 0xb4a   :  { %483 = vmin.xlane.f32.xlu0 %v482_v58 }
 0xbd7   :  { %v484_v60 = vpop.xlane.xlu0 %483 }
 0xbd8   :  { %vm485_vm1 = vcmp.eq.f32.partialorder %v482_v58, %v484_v60  ;;  %v490_v63 = vcvt.f32.s32 %v484_v60  ;;  %v897_v58 = vld [vmem:[#allocation8 + $0x74] ss:$8 sps:$4 sm:$0xff]  }
 0xbd9   :  { %v486_v62 = vsel %vm485_vm1, %v481_v61, inf }
 0xbda   :  { %487 = vmin.xlane.f32.xlu1 %v486_v62  ;;  %v491_v1 = vshll.u32 %v490_v63, 16 }
 0xc67   :  { %v488_v0 = vpop.xlane.xlu1 %487 }
 0xc68   :  { %v489_v2 = vcvt.f32.s32 %v488_v0 }
 0xc6a   :  { %v492_v3 = vadd.s32 %v491_v1, %v489_v2  ;;  %v1034_v2 = vmov 0  }
 0xc6b   :  { %700 = vmatprep.mubr.bf16.mxu0 %v1034_v2 }
 0xc6c   :  { %vm493_vm2 = vcmp.eq.s32.totalorder %v1149_v45, %v492_v3 }
 0xc6d   :  { %v494_v4 = vsel %vm493_vm2, -inf, %v474_v54  ;;  %v891_v54 = vld [vmem:[#allocation8 + $0x54] ss:$8 sps:$4 sm:$0xff]  }
 0xc6e   :  { %495 = vmax.xlane.f32.xlu0 %v494_v4  ;;  %678 = vmatprep.subr.bf16.mxu0 %v891_v54 }
 0xc6f   :  { %679 = vmatpush1.bf16.msra.mxu0 %v889_v55 }
 0xc70   :  { %680 = vmatprep.subr.bf16.mxu0 %v894_v56 }
 0xc73   :  { %681 = vmatpush1.bf16.msra.mxu0 %v892_v57 }
 0xc74   :  { %682 = vmatprep.subr.bf16.mxu0 %v897_v58 }
 0xc77   :  { %683 = vmatpush1.bf16.msra.mxu0 %v895_v59 }
 0xcfb   :  { %v496_v5 = vpop.xlane.xlu0 %495 }
 0xcfc   :  { %vm497_vm3 = vcmp.ge.f32.partialorder %v494_v4, %v496_v5  ;;  %v579_v5 = vshrl.u32 %v373_v44, 7 }
 0xcfd   :  { %v498_v6 = vsel %vm497_vm3, %v1149_v45, 128 }
 0xcfe   :  { %v500_v7 = vshra.s32 %v498_v6, 16  ;;  %v499_v9 = vand.u32 65535, %v498_v6  ;;  %v580_v6 = vsub.s32 0, %v579_v5 }
 0xd00   :  { %v502_v8 = vcvt.s32.f32 %v500_v7  ;;  %v501_v11 = vcvt.s32.f32 %v499_v9  ;;  %v576_v7 = vld [vmem:[%s1196_s6] sm:$0x3]  ;;  %s1035_s6 = smov [#allocation10]  }
 0xd01   :  { %s729_s29 = sshll.u32 %s1035_s6, 4  ;;  %s730_s29 = int_to_ptr.vmem [resolvable:$true] %s729_s29 }
 0xd02   :  { %503 = vmin.xlane.f32.xlu1 %v502_v8  ;;  %s994_s30 = scalar_lea.vmem %s730_s29, 256  ;;  %p999_p5 = scmp.lt.s32.totalorder %s730_s29, %s730_s29 }
 0xd03   :  { %p995_p4 = scmp.ne.s32.totalorder %s730_s29, %s994_s30  ;;  %p1000_p6 = scmp.lt.s32.totalorder %s994_s30, %s994_s30 }
 0xd05   :  { %p1001_p7 = por %p1000_p6, %p999_p5 }
 0xd07   :  { %p1002_p8 = pnand %p1001_p7, %p995_p4 }
 0xd8f   :  { %v504_v10 = vpop.xlane.xlu1 %503 }
 0xd90   :  { %vm505_vm4 = vcmp.eq.f32.partialorder %v502_v8, %v504_v10  ;;  %v510_v13 = vcvt.f32.s32 %v504_v10  ;;  %v581_v8 = vrot.slane %v576_v7, %v580_v6 }
 0xd91   :  { %v506_v12 = vsel %vm505_vm4, %v501_v11, inf }
 0xd92   :  { %507 = vmin.xlane.f32.xlu0 %v506_v12  ;;  %v511_v15 = vshll.u32 %v510_v13, 16 }
 0xe1f   :  { %v508_v14 = vpop.xlane.xlu0 %507 }
 0xe20   :  { %v509_v16 = vcvt.f32.s32 %v508_v14 }
 0xe22   :  { %v512_v17 = vadd.s32 %v511_v15, %v509_v16 }
 0xe24   :  { %vm513_vm5 = vcmp.eq.s32.totalorder %v1149_v45, %v512_v17 }
 0xe25   :  { %v514_v18 = vsel %vm513_vm5, -inf, %v494_v4  ;;  %v783_v4 = vpack.c.bf16 %v1145_v40, %v1145_v40 }
 0xe26   :  { %515 = vmax.xlane.f32.xlu1 %v514_v18 }
 0xeb3   :  { %v516_v19 = vpop.xlane.xlu1 %515 }
 0xeb4   :  { %vm517_vm6 = vcmp.ge.f32.partialorder %v514_v18, %v516_v19 }
 0xeb5   :  { %v518_v20 = vsel %vm517_vm6, %v1149_v45, 128 }
 0xeb6   :  { %v520_v21 = vshra.s32 %v518_v20, 16  ;;  %v519_v23 = vand.u32 65535, %v518_v20 }
 0xeb8   :  { %v522_v22 = vcvt.s32.f32 %v520_v21  ;;  %v521_v25 = vcvt.s32.f32 %v519_v23 }
 0xeba   :  { %523 = vmin.xlane.f32.xlu0 %v522_v22 }
 0xf47   :  { %v524_v24 = vpop.xlane.xlu0 %523 }
 0xf48   :  { %vm525_vm7 = vcmp.eq.f32.partialorder %v522_v22, %v524_v24  ;;  %v530_v27 = vcvt.f32.s32 %v524_v24 }
 0xf49   :  { %v526_v26 = vsel %vm525_vm7, %v521_v25, inf }
 0xf4a   :  { %527 = vmin.xlane.f32.xlu1 %v526_v26  ;;  %v531_v29 = vshll.u32 %v530_v27, 16 }
 0xfd7   :  { %v528_v28 = vpop.xlane.xlu1 %527 }
 0xfd8   :  { %v529_v30 = vcvt.f32.s32 %v528_v28 }
 0xfda   :  { %v532_v31 = vadd.s32 %v531_v29, %v529_v30 }
 0xfdc   :  { %vm533_vm8 = vcmp.eq.s32.totalorder %v1149_v45, %v532_v31 }
 0xfdd   :  { %v534_v32 = vsel %vm533_vm8, -inf, %v514_v18 }
 0xfde   :  { %535 = vmax.xlane.f32.xlu0 %v534_v32 }
0x106b   :  { %v536_v33 = vpop.xlane.xlu0 %535 }
0x106c   :  { %vm537_vm9 = vcmp.ge.f32.partialorder %v534_v32, %v536_v33 }
0x106d   :  { %v538_v34 = vsel %vm537_vm9, %v1149_v45, 128 }
0x106e   :  { %v540_v35 = vshra.s32 %v538_v34, 16  ;;  %v539_v37 = vand.u32 65535, %v538_v34 }
0x1070   :  { %v542_v36 = vcvt.s32.f32 %v540_v35  ;;  %v541_v39 = vcvt.s32.f32 %v539_v37 }
0x1072   :  { %543 = vmin.xlane.f32.xlu1 %v542_v36 }
0x10ff   :  { %v544_v38 = vpop.xlane.xlu1 %543 }
0x1100   :  { %vm545_vm10 = vcmp.eq.f32.partialorder %v542_v36, %v544_v38  ;;  %v550_v60 = vcvt.f32.s32 %v544_v38 }
0x1101   :  { %v546_v41 = vsel %vm545_vm10, %v541_v39, inf }
0x1102   :  { %547 = vmin.xlane.f32.xlu0 %v546_v41  ;;  %v551_v62 = vshll.u32 %v550_v60, 16 }
0x118f   :  { %v548_v61 = vpop.xlane.xlu0 %547 }
0x1190   :  { %v549_v63 = vcvt.f32.s32 %v548_v61 }
0x1192   :  { %v552_v0 = vadd.s32 %v551_v62, %v549_v63 }
0x1194   :  { %vm553_vm11 = vcmp.eq.s32.totalorder %v1149_v45, %v552_v0  ;;  %v584_v45 = vsub.s32 1, %v579_v5 }
0x1195   :  { %v554_v1 = vsel %vm553_vm11, -inf, %v534_v32 }
0x1196   :  { %555 = vmax.xlane.f32.xlu1 %v554_v1  ;;  %v585_v9 = vrot.slane %v576_v7, %v584_v45 }
0x1223   :  { %v556_v3 = vpop.xlane.xlu1 %555 }
0x1224   :  { %vm557_vm12 = vcmp.ge.f32.partialorder %v1145_v40, %v556_v3 }
0x1225   :  { %vm782_vm13 = vmpackc.low %vm557_vm12, %vm557_vm12 }
0x1226   :  { %784 = vmatmul.mubr.msk.bf16.vlgmr.msra.gmra.mrb[4].mxu0 %vm782_vm13, %v783_v4 }
0x12f9   :  { %v702_v10 = vpop.f32.mrb[4].mxu0 }
0x12fa   :  { %v703_v11 = vadd.f32 %v702_v10, %v581_v8  ;;  %v704_v12 = vpop.f32.mrb[5].mxu0 }
0x12fb   :  { %v705_v13 = vadd.f32 %v704_v12, %v585_v9  ;;  %v706_v14 = vpop.f32.mrb[6].mxu0 }
0x12fc   :  { %v785_v15 = vmul.f32 -1.442695, %v703_v11  ;;  %v707_v16 = vpop.f32.mrb[7].mxu0 }
0x12fd   :  { %v786_v40 = vmul.f32 -1.442695, %v705_v13 }
0x12fe   :  { %898 = vpow2.f32 %v785_v15 }
0x12ff   :  { %900 = vpow2.f32 %v786_v40 }
0x1308   :  { %v899_v17 = vpop.eup %898 }
0x1309   :  { %v901_v44 = vpop.eup %900  ;;  %v715_v18 = vadd.f32 1.0, %v899_v17 }
0x130a   :  { %v716_v19 = vadd.f32 1.0, %v901_v44 }
0x130b   :  { %902 = vrcp.f32 %v715_v18 }
0x130c   :  { %904 = vrcp.f32 %v716_v19 }
0x1315   :  { %v903_v20 = vpop.eup %902 }
0x1316   :  { %v905_v21 = vpop.eup %904  ;;  %721 = vst [vmem:[#allocation10] sm:$0xff] %v903_v20 }
0x1317   :  { %722 = vst [vmem:[#allocation10 + $0x8] sm:$0xff] %v905_v21 }
0x1318   :  { %1005 = shalt.err (!%p1002_p8)
}
0x1319   :  { %s1006_s10 = scalar_lea.hbm %s1197_s7, 256 }
0x131a   :  { %p1007_p9 = scmp.ne.s32.totalorder %s1197_s7, %s1006_s10  ;;  %p1010_p10 = scmp.lt.u32.totalorder %s1006_s10, %s1197_s7 }
0x131c   :  { %p1012_p11 = pnand %p1010_p10, %p1007_p9 }
0x131e   :  { %1015 = shalt.err (!%p1012_p11)
}
0x131f   :  { %732 = dma.vmem_to_hbm [thread:$0]  %s730_s29, 256, %s1197_s7, [#allocation4]  }
0x1320   :  { %1022 = dma.done.wait [#allocation4], 256  }
0x1321   :  { %1023 = vsyncadd [#allocation4], 4294967040 }
0x1322   :  { %736 = vsyncpa [#allocation3], 1 }
0x1323   :  { %737 = vsyncpa [#allocation6], 1 }
0x1324   :  { %738 = vsyncpa [#allocation9], 1 }
0x1325   :  { %739 = vsyncpa [#allocation4], 1 }

</bundles_post_ra>
